<compile_context>
chip_gen: v7x
topology: tpu7x:2x2x1
jax: 0.10.0
libtpu: 0.0.40
codegen_flags: <defaults>
</compile_context>

<pallas_src>
import math

import jax
import jax.numpy as jnp
from jax.experimental import pallas as pl
from jax.experimental.pallas import tpu as pltpu

_MASK_VALUE = -1e30  # large finite negative: -inf would NaN the softmax if L == 1


# ----------------------------------------------------------------------------
# Pallas kernel: fused ODA attention for a chunk of batches, all variables.
# ----------------------------------------------------------------------------
def _oda_kernel(x_ref, wqkv_ref, bqkv_ref, wo_ref, bo_ref, bias_ref, o_ref):
    Gb, L, VD = x_ref.shape            # Gb = batches in this grid step
    D = wo_ref.shape[0]
    V = VD // D
    cdt = wqkv_ref.dtype               # matmul compute dtype (f32 or bf16)
    f32 = jnp.float32

    x = x_ref[...]                     # (Gb, L, V*D): lane-dense load
    bias = bias_ref[...]               # (L, L) additive diagonal-mask bias (f32)
    wqkv = wqkv_ref[...]               # (D, 3D) fused Q/K/V weights (scale folded)
    bqkv = bqkv_ref[...]               # (1, 3D)
    wo = wo_ref[...]                   # (D, D)
    bo = bo_ref[...]                   # (1, D)

    y_parts = []
    for v in range(V):                 # static unroll over variables (V small)
        # Per-variable slice straight off the lane-dense block (lane slice).
        x_v = x[:, :, v * D:(v + 1) * D].reshape(Gb * L, D)
        if x_v.dtype != cdt:
            x_v = x_v.astype(cdt)

        # Fused 1x1-conv Q/K/V projection: one (Gb*L, D) @ (D, 3D) matmul.
        qkv = jnp.dot(x_v, wqkv, preferred_element_type=f32) + bqkv
        qkv = qkv.reshape(Gb, L, 3 * D)
        q = qkv[:, :, 0 * D:1 * D]
        k = qkv[:, :, 1 * D:2 * D]
        vv = qkv[:, :, 2 * D:3 * D]
        if cdt != f32:
            q = q.astype(cdt)
            k = k.astype(cdt)
            vv = vv.astype(cdt)

        # Attention scores, batched over the Gb batch chunk.
        s = jnp.einsum('gld,gmd->glm', q, k, preferred_element_type=f32)

        # Off-diagonal attention mask as an additive bias (0 off-diag, -1e30 on
        # the diagonal), broadcast over Gb.
        # TODO(synk): OffDiagMask source was not provided; assumed the mask is
        # the diagonal (each step attends only to *other* steps of the same
        # variable).
        s = s + bias

        # softmax over keys (dropout == identity at inference); EUP reciprocal.
        m = jnp.max(s, axis=-1, keepdims=True)
        e = jnp.exp(s - m)
        attn = e * pl.reciprocal(jnp.sum(e, axis=-1, keepdims=True), approx=True)
        if cdt != f32:
            attn = attn.astype(cdt)

        ctx = jnp.einsum('glm,gmd->gld', attn, vv, preferred_element_type=f32)

        # Output 1x1-conv projection (per variable; M = Gb*L rows).
        ctx2 = ctx.reshape(Gb * L, D)
        if ctx2.dtype != cdt:
            ctx2 = ctx2.astype(cdt)
        y_v = jnp.dot(ctx2, wo, preferred_element_type=f32) + bo
        y_parts.append(y_v.reshape(Gb, L, D))

    # Lane-concatenate the per-variable outputs: directly produces the
    # lane-dense (Gb, L, V*D) output block (unmasked vst on writeback).
    y = jnp.concatenate(y_parts, axis=-1)
    o_ref[...] = y.astype(o_ref.dtype)


# ----------------------------------------------------------------------------
# Generation-aware tiling heuristics.
# ----------------------------------------------------------------------------
def _vmem_plan():
    """Returns (vmem_limit_bytes, block_budget_bytes), generation-aware."""
    try:
        cap = int(pltpu.get_tpu_info().vmem_capacity_bytes)
    except Exception:
        cap = 64 * 1024 * 1024  # conservative default (v7x per-TC VMEM)
    vmem_limit = max(32 * 1024 * 1024, min(cap - 16 * 1024 * 1024, 64 * 1024 * 1024))
    budget = (vmem_limit * 3) // 4
    return vmem_limit, budget


def _num_tensorcores():
    """Best-effort TensorCore count per device (2 on v7x, else 1)."""
    try:
        d = jax.devices()[0]
        kind = str(getattr(d, "device_kind", "")).lower()
        if "v7" in kind or "7x" in kind:
            return 2
        nc = getattr(d, "num_cores", None)
        return int(nc) if nc else 1
    except Exception:
        return 1


def _choose_batch_block(B, L, V, D, vmem_budget_bytes):
    """Largest per-step batch chunk that fits the VMEM budget.  On multi-TC
    chips, keep at least `num_cores` grid steps so no core idles; on single-TC
    chips, prefer a single maximal step (no per-step pipeline overhead)."""
    words_per_b = (4 * L * V * D          # double-buffered in + out blocks
                   + 4 * L * V * D        # qkv / q,k,v / ctx working copies
                   + 2 * V * L * L        # scores + softmax temporaries
                   + 2 * L * V * D)       # assembled output + slack
    bytes_per_b = 4 * max(words_per_b, 1)
    cap = max(1, int(vmem_budget_bytes) // bytes_per_b)
    ncores = _num_tensorcores()
    if ncores > 1 and B > 1:
        cap = min(cap, pl.cdiv(B, ncores))   # >= ncores grid steps
    return max(1, min(B, cap))


# ----------------------------------------------------------------------------
# Parameter preparation (hoisted out of the forward path, done once).
# ----------------------------------------------------------------------------
def prepare_oda_params(raw_params, d_model, matmul_dtype=jnp.float32):
    """Fuse Q/K/V weights, fold the softmax scale into Q, transpose for x @ W."""
    wq, bq, wk, bk, wv, bv, wo, bo = raw_params
    scale = 1.0 / math.sqrt(d_model)
    w_qkv = jnp.concatenate([wq.T * scale, wk.T, wv.T], axis=1).astype(matmul_dtype)
    b_qkv = jnp.concatenate([bq * scale, bk, bv]).reshape(1, 3 * d_model)
    b_qkv = b_qkv.astype(jnp.float32)
    w_o = wo.T.astype(matmul_dtype)
    b_o = bo.reshape(1, d_model).astype(jnp.float32)
    return w_qkv, b_qkv, w_o, b_o


# ----------------------------------------------------------------------------
# ODA attention wrapper: native (B, L, V, D) in / out, no HBM transposes.
# ----------------------------------------------------------------------------
def oda_attention(x_blvd, prepared_params, *, b_block=None):
    """x_blvd: (B, L, V, D) float32. Returns (B, L, V, D) float32."""
    B, L, V, D = x_blvd.shape
    w_qkv, b_qkv, w_o, b_o = prepared_params
    VD = V * D

    # Free reshape (no transpose, no HBM copy): lane-dense last dim.
    x2 = x_blvd.reshape(B, L, VD)

    # Additive diagonal-mask bias, built once per call (tiny).
    bias = jnp.where(jnp.eye(L, dtype=bool), _MASK_VALUE, 0.0).astype(jnp.float32)

    vmem_limit, budget = _vmem_plan()
    if b_block is None:
        b_block = _choose_batch_block(B, L, V, D, budget)
    grid_b = pl.cdiv(B, b_block)
    Bp = grid_b * b_block
    if Bp != B:                               # pad the tail instead of G -> 1 cliff
        x2 = jnp.pad(x2, ((0, Bp - B), (0, 0), (0, 0)))

    weight_bytes = int(w_qkv.size * w_qkv.dtype.itemsize + b_qkv.size * 4
                       + w_o.size * w_o.dtype.itemsize + b_o.size * 4
                       + bias.size * 4)
    cost = pl.CostEstimate(
        flops=int(2 * Bp * L * V * (3 * D * D + D * D) + 4 * Bp * V * L * L * D),
        transcendentals=int(Bp * V * L * L),
        bytes_accessed=int(2 * Bp * L * VD * 4 + weight_bytes),
    )

    out = pl.pallas_call(
        _oda_kernel,
        out_shape=jax.ShapeDtypeStruct((Bp, L, VD), jnp.float32),
        grid=(grid_b,),
        in_specs=[
            pl.BlockSpec((b_block, L, VD), lambda i: (i, 0, 0)),   # activations
            pl.BlockSpec((D, 3 * D), lambda i: (0, 0)),            # fused W_qkv
            pl.BlockSpec((1, 3 * D), lambda i: (0, 0)),            # fused b_qkv
            pl.BlockSpec((D, D), lambda i: (0, 0)),                # W_out
            pl.BlockSpec((1, D), lambda i: (0, 0)),                # b_out
            pl.BlockSpec((L, L), lambda i: (0, 0)),                # diag mask bias
        ],
        out_specs=pl.BlockSpec((b_block, L, VD), lambda i: (i, 0, 0)),
        compiler_params=pltpu.CompilerParams(
            dimension_semantics=("parallel",),
            vmem_limit_bytes=vmem_limit,
        ),
        cost_estimate=cost,
    )(x2, w_qkv, b_qkv, w_o, b_o, bias)

    if Bp != B:
        out = out[:B]
    return out.reshape(B, L, V, D)


# ----------------------------------------------------------------------------
# Plain-JAX glue: AvgPool2d((3,1), stride=(2,1), pad=(1,0)) and bilinear resize.
# ----------------------------------------------------------------------------
def avg_pool_time(x):
    """x: (B, L, V, D) -> (B, L', V, D). PyTorch AvgPool2d, count_include_pad=True."""
    B, L, V, D = x.shape
    xp = jnp.pad(x, ((0, 0), (1, 1), (0, 0), (0, 0)))
    Lp = (L + 2 - 3) // 2 + 1
    idx = jnp.arange(Lp) * 2
    return (xp[:, idx] + xp[:, idx + 1] + xp[:, idx + 2]) / 3.0


def resize_linear_axis(x, axis, out_size):
    """PyTorch F.interpolate(mode='bilinear', align_corners=False), one axis."""
    in_size = x.shape[axis]
    if in_size == out_size:
        return x
    scale = in_size / out_size
    dst = jnp.arange(out_size, dtype=jnp.float32)
    src = jnp.maximum((dst + 0.5) * scale - 0.5, 0.0)
    x0 = jnp.floor(src).astype(jnp.int32)
    x1 = jnp.minimum(x0 + 1, in_size - 1)
    w1 = src - x0.astype(jnp.float32)
    w0 = 1.0 - w1
    g0 = jnp.take(x, x0, axis=axis)
    g1 = jnp.take(x, x1, axis=axis)
    shp = [1] * x.ndim
    shp[axis] = out_size
    return g0 * w0.reshape(shp) + g1 * w1.reshape(shp)


# ----------------------------------------------------------------------------
# ODA_layer forward.
# ----------------------------------------------------------------------------
def oda_layer_forward(x, prepared_params, *, label_len, enc_in, num_layers):
    """x: (B, label_len, enc_in, d_model). Returns (x_downsampled, out)."""
    if num_layers:
        x = avg_pool_time(x)                       # (B, L', V, D)

    out = oda_attention(x, prepared_params)        # native layout, no transposes

    if num_layers:
        # F.interpolate(..., size=(enc_in, label_len), mode='bilinear')
        out = resize_linear_axis(out, axis=1, out_size=label_len)
        out = resize_linear_axis(out, axis=2, out_size=enc_in)
    return x, out


def init_params(key, d_model):
    ks = jax.random.split(key, 8)
    w = lambda k: (jax.random.normal(k, (d_model, d_model), jnp.float32)
                   / math.sqrt(d_model))
    b = lambda k: 0.1 * jax.random.normal(k, (d_model,), jnp.float32)
    return (w(ks[0]), b(ks[1]), w(ks[2]), b(ks[3]),
            w(ks[4]), b(ks[5]), w(ks[6]), b(ks[7]))


# ----------------------------------------------------------------------------
# Pure-JAX reference for the ODA block (module semantics, for sanity check).
# ----------------------------------------------------------------------------
def oda_reference(x_blvd, raw_params):
    wq, bq, wk, bk, wv, bv_, wo, bo = raw_params
    B, L, V, D = x_blvd.shape
    scale = 1.0 / math.sqrt(D)
    q = x_blvd @ wq.T + bq
    k = x_blvd @ wk.T + bk
    v = x_blvd @ wv.T + bv_
    scores = jnp.einsum('blvd,bmvd->bvlm', q, k)
    scores = jnp.where(jnp.eye(L, dtype=bool)[None, None, :, :], -jnp.inf, scores)
    attn = jax.nn.softmax(scale * scores, axis=-1)
    out = jnp.einsum('bvlm,bmvd->blvd', attn, v)
    return out @ wo.T + bo


if __name__ == "__main__":
    B, label_len, enc_in, d_model, num_layers = 2, 16, 4, 32, 1

    key = jax.random.PRNGKey(0)
    kx, kp = jax.random.split(key)
    x = jax.random.normal(kx, (B, label_len, enc_in, d_model), jnp.float32)
    raw = init_params(kp, d_model)

    # Parameter prep hoisted out of the forward path (done once).
    params_f32 = prepare_oda_params(raw, d_model)

    x_ds, out = oda_layer_forward(
        x, params_f32, label_len=label_len, enc_in=enc_in, num_layers=num_layers)
    jax.block_until_ready((x_ds, out))
    assert x_ds.shape == (B, label_len // 2, enc_in, d_model)
    assert out.shape == (B, label_len, enc_in, d_model)

    # Verify the fused Pallas attention kernel against a pure-JAX reference.
    # (Tolerance covers the approximate EUP reciprocal used in the softmax.)
    got = oda_attention(x_ds, params_f32)
    ref = oda_reference(x_ds, raw)
    assert got.shape == ref.shape
    assert bool(jnp.all(jnp.isfinite(got)))
    assert jnp.allclose(got, ref, atol=1e-2, rtol=1e-2), "kernel mismatch (f32)"

    # bf16 matmul path (targets the v6e/v7x 256x256 MXU; f32 accumulation).
    params_bf16 = prepare_oda_params(raw, d_model, matmul_dtype=jnp.bfloat16)
    got_bf16 = oda_attention(x_ds, params_bf16)
    jax.block_until_ready(got_bf16)
    assert jnp.allclose(got_bf16, ref, atol=1e-1, rtol=1e-1), "kernel mismatch (bf16)"

    print("KERNEL_OK")
</pallas_src>

<mosaic_0001>
module attributes {stable_mosaic.version = 11 : i64} {
  func.func @_oda_kernel(%arg0: i32, %arg1: memref<2x8x128xf32, #tpu.memory_space<vmem>>, %arg2: memref<32x96xf32, #tpu.memory_space<vmem>>, %arg3: memref<1x96xf32, #tpu.memory_space<vmem>>, %arg4: memref<32x32xf32, #tpu.memory_space<vmem>>, %arg5: memref<1x32xf32, #tpu.memory_space<vmem>>, %arg6: memref<8x8xf32, #tpu.memory_space<vmem>>, %arg7: memref<2x8x128xf32, #tpu.memory_space<vmem>>) attributes {dimension_semantics = [#tpu.dimension_semantics<parallel>], iteration_bounds = array<i64: 1>, scalar_prefetch = 0 : i64, scratch_operands = 0 : i64, tpu.core_type = #tpu.core_type<tc>, window_params = [{transform_indices = @transform_0, window_bounds = array<i64: 2, 8, 128>}, {pipeline_mode = #tpu.pipeline_mode<synchronous>, transform_indices = @transform_1, window_bounds = array<i64: 32, 96>}, {pipeline_mode = #tpu.pipeline_mode<synchronous>, transform_indices = @transform_2, window_bounds = array<i64: 1, 96>}, {pipeline_mode = #tpu.pipeline_mode<synchronous>, transform_indices = @transform_3, window_bounds = array<i64: 32, 32>}, {pipeline_mode = #tpu.pipeline_mode<synchronous>, transform_indices = @transform_4, window_bounds = array<i64: 1, 32>}, {pipeline_mode = #tpu.pipeline_mode<synchronous>, transform_indices = @transform_5, window_bounds = array<i64: 8, 8>}, {transform_indices = @transform_6, window_bounds = array<i64: 2, 8, 128>}]} {
    %c0 = arith.constant 0 : index
    %c0_0 = arith.constant 0 : index
    %c0_1 = arith.constant 0 : index
    %0 = vector.load %arg1[%c0, %c0_0, %c0_1] : memref<2x8x128xf32, #tpu.memory_space<vmem>>, vector<2x8x128xf32>
    %c0_2 = arith.constant 0 : index
    %c0_3 = arith.constant 0 : index
    %1 = vector.load %arg6[%c0_2, %c0_3] : memref<8x8xf32, #tpu.memory_space<vmem>>, vector<8x8xf32>
    %c0_4 = arith.constant 0 : index
    %c0_5 = arith.constant 0 : index
    %2 = vector.load %arg2[%c0_4, %c0_5] : memref<32x96xf32, #tpu.memory_space<vmem>>, vector<32x96xf32>
    %c0_6 = arith.constant 0 : index
    %c0_7 = arith.constant 0 : index
    %3 = vector.load %arg3[%c0_6, %c0_7] : memref<1x96xf32, #tpu.memory_space<vmem>>, vector<1x96xf32>
    %c0_8 = arith.constant 0 : index
    %c0_9 = arith.constant 0 : index
    %4 = vector.load %arg4[%c0_8, %c0_9] : memref<32x32xf32, #tpu.memory_space<vmem>>, vector<32x32xf32>
    %c0_10 = arith.constant 0 : index
    %c0_11 = arith.constant 0 : index
    %5 = vector.load %arg5[%c0_10, %c0_11] : memref<1x32xf32, #tpu.memory_space<vmem>>, vector<1x32xf32>
    %6 = vector.extract_strided_slice %0 {offsets = [0, 0, 0], sizes = [2, 8, 32], strides = [1, 1, 1]} : vector<2x8x128xf32> to vector<2x8x32xf32>
    %7 = vector.shape_cast %6 : vector<2x8x32xf32> to vector<16x32xf32>
    %cst = arith.constant dense<0.000000e+00> : vector<16x96xf32>
    %8 = tpu.matmul %7, %2, %cst {dimension_numbers = #tpu.dot_dimension_numbers<[1], [0], [0], [1], [0, 0, 1, 1], [], []>} : vector<16x32xf32>, vector<32x96xf32>, vector<16x96xf32> -> vector<16x96xf32>
    %9 = vector.broadcast %3 : vector<1x96xf32> to vector<16x96xf32>
    %10 = arith.addf %8, %9 : vector<16x96xf32>
    %11 = vector.shape_cast %10 : vector<16x96xf32> to vector<2x8x96xf32>
    %12 = vector.extract_strided_slice %11 {offsets = [0, 0, 0], sizes = [2, 8, 32], strides = [1, 1, 1]} : vector<2x8x96xf32> to vector<2x8x32xf32>
    %13 = vector.extract_strided_slice %11 {offsets = [0, 0, 32], sizes = [2, 8, 32], strides = [1, 1, 1]} : vector<2x8x96xf32> to vector<2x8x32xf32>
    %14 = vector.extract_strided_slice %11 {offsets = [0, 0, 64], sizes = [2, 8, 32], strides = [1, 1, 1]} : vector<2x8x96xf32> to vector<2x8x32xf32>
    "tpu.trace_start"() <{level = 10 : i32, message = "gld,gmd->glm"}> : () -> ()
    %cst_12 = arith.constant dense<0.000000e+00> : vector<2x8x8xf32>
    %15 = tpu.matmul %12, %13, %cst_12 {dimension_numbers = #tpu.dot_dimension_numbers<[2], [2], [1], [1], [0, 0, 0, 1, 1, 1], [0], [0]>} : vector<2x8x32xf32>, vector<2x8x32xf32>, vector<2x8x8xf32> -> vector<2x8x8xf32>
    "tpu.trace_stop"() : () -> ()
    %16 = vector.shape_cast %1 : vector<8x8xf32> to vector<1x8x8xf32>
    %17 = vector.broadcast %16 : vector<1x8x8xf32> to vector<2x8x8xf32>
    %18 = arith.addf %15, %17 : vector<2x8x8xf32>
    %cst_13 = arith.constant dense<0xFF800000> : vector<2x8xf32>
    %19 = vector.multi_reduction <maximumf>, %18, %cst_13 [2] : vector<2x8x8xf32> to vector<2x8xf32>
    %20 = vector.shape_cast %19 : vector<2x8xf32> to vector<2x8x1xf32>
    %21 = vector.broadcast %20 : vector<2x8x1xf32> to vector<2x8x8xf32>
    %22 = arith.subf %18, %21 : vector<2x8x8xf32>
    %23 = math.exp %22 : vector<2x8x8xf32>
    %cst_14 = arith.constant dense<0.000000e+00> : vector<2x8xf32>
    %24 = vector.multi_reduction <add>, %23, %cst_14 [2] : vector<2x8x8xf32> to vector<2x8xf32>
    %25 = vector.shape_cast %24 : vector<2x8xf32> to vector<2x8x1xf32>
    %26 = tpu.reciprocal %25 {approx = true} : vector<2x8x1xf32> -> vector<2x8x1xf32>
    %27 = vector.broadcast %26 : vector<2x8x1xf32> to vector<2x8x8xf32>
    %28 = arith.mulf %23, %27 : vector<2x8x8xf32>
    "tpu.trace_start"() <{level = 10 : i32, message = "glm,gmd->gld"}> : () -> ()
    %cst_15 = arith.constant dense<0.000000e+00> : vector<2x8x32xf32>
    %29 = tpu.matmul %28, %14, %cst_15 {dimension_numbers = #tpu.dot_dimension_numbers<[2], [1], [1], [2], [0, 0, 0, 1, 1, 2], [0], [0]>} : vector<2x8x8xf32>, vector<2x8x32xf32>, vector<2x8x32xf32> -> vector<2x8x32xf32>
    "tpu.trace_stop"() : () -> ()
    %30 = vector.shape_cast %29 : vector<2x8x32xf32> to vector<16x32xf32>
    %cst_16 = arith.constant dense<0.000000e+00> : vector<16x32xf32>
    %31 = tpu.matmul %30, %4, %cst_16 {dimension_numbers = #tpu.dot_dimension_numbers<[1], [0], [0], [1], [0, 0, 1, 1], [], []>} : vector<16x32xf32>, vector<32x32xf32>, vector<16x32xf32> -> vector<16x32xf32>
    %32 = vector.broadcast %5 : vector<1x32xf32> to vector<16x32xf32>
    %33 = arith.addf %31, %32 : vector<16x32xf32>
    %34 = vector.shape_cast %33 : vector<16x32xf32> to vector<2x8x32xf32>
    %35 = vector.extract_strided_slice %0 {offsets = [0, 0, 32], sizes = [2, 8, 32], strides = [1, 1, 1]} : vector<2x8x128xf32> to vector<2x8x32xf32>
    %36 = vector.shape_cast %35 : vector<2x8x32xf32> to vector<16x32xf32>
    %cst_17 = arith.constant dense<0.000000e+00> : vector<16x96xf32>
    %37 = tpu.matmul %36, %2, %cst_17 {dimension_numbers = #tpu.dot_dimension_numbers<[1], [0], [0], [1], [0, 0, 1, 1], [], []>} : vector<16x32xf32>, vector<32x96xf32>, vector<16x96xf32> -> vector<16x96xf32>
    %38 = vector.broadcast %3 : vector<1x96xf32> to vector<16x96xf32>
    %39 = arith.addf %37, %38 : vector<16x96xf32>
    %40 = vector.shape_cast %39 : vector<16x96xf32> to vector<2x8x96xf32>
    %41 = vector.extract_strided_slice %40 {offsets = [0, 0, 0], sizes = [2, 8, 32], strides = [1, 1, 1]} : vector<2x8x96xf32> to vector<2x8x32xf32>
    %42 = vector.extract_strided_slice %40 {offsets = [0, 0, 32], sizes = [2, 8, 32], strides = [1, 1, 1]} : vector<2x8x96xf32> to vector<2x8x32xf32>
    %43 = vector.extract_strided_slice %40 {offsets = [0, 0, 64], sizes = [2, 8, 32], strides = [1, 1, 1]} : vector<2x8x96xf32> to vector<2x8x32xf32>
    "tpu.trace_start"() <{level = 10 : i32, message = "gld,gmd->glm"}> : () -> ()
    %cst_18 = arith.constant dense<0.000000e+00> : vector<2x8x8xf32>
    %44 = tpu.matmul %41, %42, %cst_18 {dimension_numbers = #tpu.dot_dimension_numbers<[2], [2], [1], [1], [0, 0, 0, 1, 1, 1], [0], [0]>} : vector<2x8x32xf32>, vector<2x8x32xf32>, vector<2x8x8xf32> -> vector<2x8x8xf32>
    "tpu.trace_stop"() : () -> ()
    %45 = vector.shape_cast %1 : vector<8x8xf32> to vector<1x8x8xf32>
    %46 = vector.broadcast %45 : vector<1x8x8xf32> to vector<2x8x8xf32>
    %47 = arith.addf %44, %46 : vector<2x8x8xf32>
    %cst_19 = arith.constant dense<0xFF800000> : vector<2x8xf32>
    %48 = vector.multi_reduction <maximumf>, %47, %cst_19 [2] : vector<2x8x8xf32> to vector<2x8xf32>
    %49 = vector.shape_cast %48 : vector<2x8xf32> to vector<2x8x1xf32>
    %50 = vector.broadcast %49 : vector<2x8x1xf32> to vector<2x8x8xf32>
    %51 = arith.subf %47, %50 : vector<2x8x8xf32>
    %52 = math.exp %51 : vector<2x8x8xf32>
    %cst_20 = arith.constant dense<0.000000e+00> : vector<2x8xf32>
    %53 = vector.multi_reduction <add>, %52, %cst_20 [2] : vector<2x8x8xf32> to vector<2x8xf32>
    %54 = vector.shape_cast %53 : vector<2x8xf32> to vector<2x8x1xf32>
    %55 = tpu.reciprocal %54 {approx = true} : vector<2x8x1xf32> -> vector<2x8x1xf32>
    %56 = vector.broadcast %55 : vector<2x8x1xf32> to vector<2x8x8xf32>
    %57 = arith.mulf %52, %56 : vector<2x8x8xf32>
    "tpu.trace_start"() <{level = 10 : i32, message = "glm,gmd->gld"}> : () -> ()
    %cst_21 = arith.constant dense<0.000000e+00> : vector<2x8x32xf32>
    %58 = tpu.matmul %57, %43, %cst_21 {dimension_numbers = #tpu.dot_dimension_numbers<[2], [1], [1], [2], [0, 0, 0, 1, 1, 2], [0], [0]>} : vector<2x8x8xf32>, vector<2x8x32xf32>, vector<2x8x32xf32> -> vector<2x8x32xf32>
    "tpu.trace_stop"() : () -> ()
    %59 = vector.shape_cast %58 : vector<2x8x32xf32> to vector<16x32xf32>
    %cst_22 = arith.constant dense<0.000000e+00> : vector<16x32xf32>
    %60 = tpu.matmul %59, %4, %cst_22 {dimension_numbers = #tpu.dot_dimension_numbers<[1], [0], [0], [1], [0, 0, 1, 1], [], []>} : vector<16x32xf32>, vector<32x32xf32>, vector<16x32xf32> -> vector<16x32xf32>
    %61 = vector.broadcast %5 : vector<1x32xf32> to vector<16x32xf32>
    %62 = arith.addf %60, %61 : vector<16x32xf32>
    %63 = vector.shape_cast %62 : vector<16x32xf32> to vector<2x8x32xf32>
    %64 = vector.extract_strided_slice %0 {offsets = [0, 0, 64], sizes = [2, 8, 32], strides = [1, 1, 1]} : vector<2x8x128xf32> to vector<2x8x32xf32>
    %65 = vector.shape_cast %64 : vector<2x8x32xf32> to vector<16x32xf32>
    %cst_23 = arith.constant dense<0.000000e+00> : vector<16x96xf32>
    %66 = tpu.matmul %65, %2, %cst_23 {dimension_numbers = #tpu.dot_dimension_numbers<[1], [0], [0], [1], [0, 0, 1, 1], [], []>} : vector<16x32xf32>, vector<32x96xf32>, vector<16x96xf32> -> vector<16x96xf32>
    %67 = vector.broadcast %3 : vector<1x96xf32> to vector<16x96xf32>
    %68 = arith.addf %66, %67 : vector<16x96xf32>
    %69 = vector.shape_cast %68 : vector<16x96xf32> to vector<2x8x96xf32>
    %70 = vector.extract_strided_slice %69 {offsets = [0, 0, 0], sizes = [2, 8, 32], strides = [1, 1, 1]} : vector<2x8x96xf32> to vector<2x8x32xf32>
    %71 = vector.extract_strided_slice %69 {offsets = [0, 0, 32], sizes = [2, 8, 32], strides = [1, 1, 1]} : vector<2x8x96xf32> to vector<2x8x32xf32>
    %72 = vector.extract_strided_slice %69 {offsets = [0, 0, 64], sizes = [2, 8, 32], strides = [1, 1, 1]} : vector<2x8x96xf32> to vector<2x8x32xf32>
    "tpu.trace_start"() <{level = 10 : i32, message = "gld,gmd->glm"}> : () -> ()
    %cst_24 = arith.constant dense<0.000000e+00> : vector<2x8x8xf32>
    %73 = tpu.matmul %70, %71, %cst_24 {dimension_numbers = #tpu.dot_dimension_numbers<[2], [2], [1], [1], [0, 0, 0, 1, 1, 1], [0], [0]>} : vector<2x8x32xf32>, vector<2x8x32xf32>, vector<2x8x8xf32> -> vector<2x8x8xf32>
    "tpu.trace_stop"() : () -> ()
    %74 = vector.shape_cast %1 : vector<8x8xf32> to vector<1x8x8xf32>
    %75 = vector.broadcast %74 : vector<1x8x8xf32> to vector<2x8x8xf32>
    %76 = arith.addf %73, %75 : vector<2x8x8xf32>
    %cst_25 = arith.constant dense<0xFF800000> : vector<2x8xf32>
    %77 = vector.multi_reduction <maximumf>, %76, %cst_25 [2] : vector<2x8x8xf32> to vector<2x8xf32>
    %78 = vector.shape_cast %77 : vector<2x8xf32> to vector<2x8x1xf32>
    %79 = vector.broadcast %78 : vector<2x8x1xf32> to vector<2x8x8xf32>
    %80 = arith.subf %76, %79 : vector<2x8x8xf32>
    %81 = math.exp %80 : vector<2x8x8xf32>
    %cst_26 = arith.constant dense<0.000000e+00> : vector<2x8xf32>
    %82 = vector.multi_reduction <add>, %81, %cst_26 [2] : vector<2x8x8xf32> to vector<2x8xf32>
    %83 = vector.shape_cast %82 : vector<2x8xf32> to vector<2x8x1xf32>
    %84 = tpu.reciprocal %83 {approx = true} : vector<2x8x1xf32> -> vector<2x8x1xf32>
    %85 = vector.broadcast %84 : vector<2x8x1xf32> to vector<2x8x8xf32>
    %86 = arith.mulf %81, %85 : vector<2x8x8xf32>
    "tpu.trace_start"() <{level = 10 : i32, message = "glm,gmd->gld"}> : () -> ()
    %cst_27 = arith.constant dense<0.000000e+00> : vector<2x8x32xf32>
    %87 = tpu.matmul %86, %72, %cst_27 {dimension_numbers = #tpu.dot_dimension_numbers<[2], [1], [1], [2], [0, 0, 0, 1, 1, 2], [0], [0]>} : vector<2x8x8xf32>, vector<2x8x32xf32>, vector<2x8x32xf32> -> vector<2x8x32xf32>
    "tpu.trace_stop"() : () -> ()
    %88 = vector.shape_cast %87 : vector<2x8x32xf32> to vector<16x32xf32>
    %cst_28 = arith.constant dense<0.000000e+00> : vector<16x32xf32>
    %89 = tpu.matmul %88, %4, %cst_28 {dimension_numbers = #tpu.dot_dimension_numbers<[1], [0], [0], [1], [0, 0, 1, 1], [], []>} : vector<16x32xf32>, vector<32x32xf32>, vector<16x32xf32> -> vector<16x32xf32>
    %90 = vector.broadcast %5 : vector<1x32xf32> to vector<16x32xf32>
    %91 = arith.addf %89, %90 : vector<16x32xf32>
    %92 = vector.shape_cast %91 : vector<16x32xf32> to vector<2x8x32xf32>
    %93 = vector.extract_strided_slice %0 {offsets = [0, 0, 96], sizes = [2, 8, 32], strides = [1, 1, 1]} : vector<2x8x128xf32> to vector<2x8x32xf32>
    %94 = vector.shape_cast %93 : vector<2x8x32xf32> to vector<16x32xf32>
    %cst_29 = arith.constant dense<0.000000e+00> : vector<16x96xf32>
    %95 = tpu.matmul %94, %2, %cst_29 {dimension_numbers = #tpu.dot_dimension_numbers<[1], [0], [0], [1], [0, 0, 1, 1], [], []>} : vector<16x32xf32>, vector<32x96xf32>, vector<16x96xf32> -> vector<16x96xf32>
    %96 = vector.broadcast %3 : vector<1x96xf32> to vector<16x96xf32>
    %97 = arith.addf %95, %96 : vector<16x96xf32>
    %98 = vector.shape_cast %97 : vector<16x96xf32> to vector<2x8x96xf32>
    %99 = vector.extract_strided_slice %98 {offsets = [0, 0, 0], sizes = [2, 8, 32], strides = [1, 1, 1]} : vector<2x8x96xf32> to vector<2x8x32xf32>
    %100 = vector.extract_strided_slice %98 {offsets = [0, 0, 32], sizes = [2, 8, 32], strides = [1, 1, 1]} : vector<2x8x96xf32> to vector<2x8x32xf32>
    %101 = vector.extract_strided_slice %98 {offsets = [0, 0, 64], sizes = [2, 8, 32], strides = [1, 1, 1]} : vector<2x8x96xf32> to vector<2x8x32xf32>
    "tpu.trace_start"() <{level = 10 : i32, message = "gld,gmd->glm"}> : () -> ()
    %cst_30 = arith.constant dense<0.000000e+00> : vector<2x8x8xf32>
    %102 = tpu.matmul %99, %100, %cst_30 {dimension_numbers = #tpu.dot_dimension_numbers<[2], [2], [1], [1], [0, 0, 0, 1, 1, 1], [0], [0]>} : vector<2x8x32xf32>, vector<2x8x32xf32>, vector<2x8x8xf32> -> vector<2x8x8xf32>
    "tpu.trace_stop"() : () -> ()
    %103 = vector.shape_cast %1 : vector<8x8xf32> to vector<1x8x8xf32>
    %104 = vector.broadcast %103 : vector<1x8x8xf32> to vector<2x8x8xf32>
    %105 = arith.addf %102, %104 : vector<2x8x8xf32>
    %cst_31 = arith.constant dense<0xFF800000> : vector<2x8xf32>
    %106 = vector.multi_reduction <maximumf>, %105, %cst_31 [2] : vector<2x8x8xf32> to vector<2x8xf32>
    %107 = vector.shape_cast %106 : vector<2x8xf32> to vector<2x8x1xf32>
    %108 = vector.broadcast %107 : vector<2x8x1xf32> to vector<2x8x8xf32>
    %109 = arith.subf %105, %108 : vector<2x8x8xf32>
    %110 = math.exp %109 : vector<2x8x8xf32>
    %cst_32 = arith.constant dense<0.000000e+00> : vector<2x8xf32>
    %111 = vector.multi_reduction <add>, %110, %cst_32 [2] : vector<2x8x8xf32> to vector<2x8xf32>
    %112 = vector.shape_cast %111 : vector<2x8xf32> to vector<2x8x1xf32>
    %113 = tpu.reciprocal %112 {approx = true} : vector<2x8x1xf32> -> vector<2x8x1xf32>
    %114 = vector.broadcast %113 : vector<2x8x1xf32> to vector<2x8x8xf32>
    %115 = arith.mulf %110, %114 : vector<2x8x8xf32>
    "tpu.trace_start"() <{level = 10 : i32, message = "glm,gmd->gld"}> : () -> ()
    %cst_33 = arith.constant dense<0.000000e+00> : vector<2x8x32xf32>
    %116 = tpu.matmul %115, %101, %cst_33 {dimension_numbers = #tpu.dot_dimension_numbers<[2], [1], [1], [2], [0, 0, 0, 1, 1, 2], [0], [0]>} : vector<2x8x8xf32>, vector<2x8x32xf32>, vector<2x8x32xf32> -> vector<2x8x32xf32>
    "tpu.trace_stop"() : () -> ()
    %117 = vector.shape_cast %116 : vector<2x8x32xf32> to vector<16x32xf32>
    %cst_34 = arith.constant dense<0.000000e+00> : vector<16x32xf32>
    %118 = tpu.matmul %117, %4, %cst_34 {dimension_numbers = #tpu.dot_dimension_numbers<[1], [0], [0], [1], [0, 0, 1, 1], [], []>} : vector<16x32xf32>, vector<32x32xf32>, vector<16x32xf32> -> vector<16x32xf32>
    %119 = vector.broadcast %5 : vector<1x32xf32> to vector<16x32xf32>
    %120 = arith.addf %118, %119 : vector<16x32xf32>
    %121 = vector.shape_cast %120 : vector<16x32xf32> to vector<2x8x32xf32>
    %122 = tpu.concatenate %34, %63, %92, %121 in 2 : vector<2x8x32xf32>, vector<2x8x32xf32>, vector<2x8x32xf32>, vector<2x8x32xf32> -> vector<2x8x128xf32>
    %c0_35 = arith.constant 0 : index
    %c0_36 = arith.constant 0 : index
    %c0_37 = arith.constant 0 : index
    %123 = vector.load %arg7[%c0_35, %c0_36, %c0_37] : memref<2x8x128xf32, #tpu.memory_space<vmem>>, vector<2x8x128xf32>
    tpu.vector_store %arg7[%c0_35, %c0_36, %c0_37], %122 {strides = array<i32>} : memref<2x8x128xf32, #tpu.memory_space<vmem>>, vector<2x8x128xf32>,
    return
  }
  func.func @transform_0(%arg0: i32) -> (i32, i32, i32) {
    %c0_i32 = arith.constant 0 : i32
    %c0_i32_0 = arith.constant 0 : i32
    %c0_i32_1 = arith.constant 0 : i32
    return %arg0, %c0_i32, %c0_i32_0 : i32, i32, i32
  }
  func.func @transform_1(%arg0: i32) -> (i32, i32) {
    %c0_i32 = arith.constant 0 : i32
    %c0_i32_0 = arith.constant 0 : i32
    %c0_i32_1 = arith.constant 0 : i32
    return %c0_i32, %c0_i32_0 : i32, i32
  }
  func.func @transform_2(%arg0: i32) -> (i32, i32) {
    %c0_i32 = arith.constant 0 : i32
    %c0_i32_0 = arith.constant 0 : i32
    %c0_i32_1 = arith.constant 0 : i32
    return %c0_i32, %c0_i32_0 : i32, i32
  }
  func.func @transform_3(%arg0: i32) -> (i32, i32) {
    %c0_i32 = arith.constant 0 : i32
    %c0_i32_0 = arith.constant 0 : i32
    %c0_i32_1 = arith.constant 0 : i32
    return %c0_i32, %c0_i32_0 : i32, i32
  }
  func.func @transform_4(%arg0: i32) -> (i32, i32) {
    %c0_i32 = arith.constant 0 : i32
    %c0_i32_0 = arith.constant 0 : i32
    %c0_i32_1 = arith.constant 0 : i32
    return %c0_i32, %c0_i32_0 : i32, i32
  }
  func.func @transform_5(%arg0: i32) -> (i32, i32) {
    %c0_i32 = arith.constant 0 : i32
    %c0_i32_0 = arith.constant 0 : i32
    %c0_i32_1 = arith.constant 0 : i32
    return %c0_i32, %c0_i32_0 : i32, i32
  }
  func.func @transform_6(%arg0: i32) -> (i32, i32, i32) {
    %c0_i32 = arith.constant 0 : i32
    %c0_i32_0 = arith.constant 0 : i32
    %c0_i32_1 = arith.constant 0 : i32
    return %arg0, %c0_i32, %c0_i32_0 : i32, i32, i32
  }
}

</mosaic_0001>

<bundles_post_ra>
// kernel: tpu_custom_call.1
= control target key start
LH: loop header
LB: loop body
LE: loop exit
PB: predicated region body
PF: predicated region fallthrough
CT: control target
= control target key end

     0   :  { %11 = vsyncpa [#allocation3], 0  ;;  %s2941_s0 = inlined_call_operand.hbm [shape: f32[2,8,128], index: 0, kind: input, shape index: {}]   ;;  %s2942_s1 = inlined_call_operand.hbm [shape: f32[32,96], index: 1, kind: input, shape index: {}]   ;;  %s2943_s2 = inlined_call_operand.vmem [shape: f32[1,96], index: 2, kind: input, shape index: {}]   ;;  %s2944_s3 = inlined_call_operand.hbm [shape: f32[32,32], index: 3, kind: input, shape index: {}]   ;;  %s2945_s4 = inlined_call_operand.vmem [shape: f32[1,32], index: 4, kind: input, shape index: {}]   ;;  %s2946_s5 = inlined_call_operand.vmem [shape: f32[8,8], index: 5, kind: input, shape index: {}]   ;;  %s2947_s6 = inlined_call_operand.hbm [shape: f32[2,8,128], index: 6, kind: output, shape index: {}]  }
   0x1   :  { %12 = vsyncpa [#allocation6], 0 }
   0x2   :  { %13 = vsyncpa [#allocation4], 0  ;;  %s2601_s21 = smov [#allocation5]   ;;  %s2602_s23 = smov [#allocation2]  }
   0x3   :  { %s31_s22 = sshll.u32 %s2601_s21, 4  ;;  %s19_s24 = sshll.u32 %s2602_s23, 4  ;;  %s32_s22 = int_to_ptr.vmem [resolvable:$true] %s31_s22  ;;  %s2647_s24 = int_to_ptr.vmem [resolvable:$true] %s19_s24 }
   0x4   :  { %s2507_s27 = scalar_lea.hbm %s2942_s1, 512 }
   0x5   :  { %p2508_p0 = scmp.ne.s32.totalorder %s2942_s1, %s2507_s27  ;;  %p2511_p1 = scmp.lt.u32.totalorder %s2507_s27, %s2942_s1 }
   0x7   :  { %p2513_p2 = pnand %p2511_p1, %p2508_p0 }
   0x9   :  { %2516 = shalt.err (!%p2513_p2)
}
   0xa   :  { %s2517_s8 = scalar_lea.vmem %s32_s22, 512  ;;  %p2522_p4 = scmp.lt.s32.totalorder %s32_s22, %s32_s22 }
   0xb   :  { %p2518_p3 = scmp.ne.s32.totalorder %s32_s22, %s2517_s8  ;;  %p2523_p5 = scmp.lt.s32.totalorder %s2517_s8, %s2517_s8 }
   0xd   :  { %p2524_p6 = por %p2523_p5, %p2522_p4 }
   0xf   :  { %p2525_p7 = pnand %p2524_p6, %p2518_p3 }
  0x11   :  { %2528 = shalt.err (!%p2525_p7)
}
  0x12   :  { %s2603_s9 = smov 128   ;;  %s2604_s10 = smov 8  }
  0x13   :  { %37 = dma.hbm_to_vmem [thread:$0]  %s2942_s1, 512, %s32_s22, [#allocation6], %s2603_s9, %s2603_s9, %s2604_s10  }
  0x14   :  { %s2529_s15 = scalar_lea.hbm %s2941_s0, 256 }
  0x15   :  { %p2530_p8 = scmp.ne.s32.totalorder %s2941_s0, %s2529_s15  ;;  %p2533_p9 = scmp.lt.u32.totalorder %s2529_s15, %s2941_s0 }
  0x17   :  { %p2535_p10 = pnand %p2533_p9, %p2530_p8 }
  0x19   :  { %2538 = shalt.err (!%p2535_p10)
}
  0x1a   :  { %s2539_s20 = scalar_lea.vmem %s2647_s24, 256  ;;  %p2544_p12 = scmp.lt.s32.totalorder %s2647_s24, %s2647_s24 }
  0x1b   :  { %p2540_p11 = scmp.ne.s32.totalorder %s2647_s24, %s2539_s20  ;;  %p2545_p13 = scmp.lt.s32.totalorder %s2539_s20, %s2539_s20 }
  0x1d   :  { %p2546_p0 = por %p2545_p13, %p2544_p12 }
  0x1f   :  { %p2547_p1 = pnand %p2546_p0, %p2540_p11 }
  0x21   :  { %2550 = shalt.err (!%p2547_p1)
}
  0x22   :  { %25 = dma.hbm_to_vmem [thread:$0]  %s2941_s0, 256, %s2647_s24, [#allocation3], %s2603_s9, %s2603_s9, %s2604_s10  }
  0x23   :  { %s2605_s22 = smov [#allocation7]   ;;  %s2551_s27 = scalar_lea.hbm %s2944_s3, 512 }
  0x24   :  { %s45_s23 = sshll.u32 %s2605_s22, 4  ;;  %p2552_p2 = scmp.ne.s32.totalorder %s2944_s3, %s2551_s27  ;;  %s46_s23 = int_to_ptr.vmem [resolvable:$true] %s45_s23 }
  0x25   :  { %p2555_p3 = scmp.lt.u32.totalorder %s2551_s27, %s2944_s3 }
  0x27   :  { %p2557_p4 = pnand %p2555_p3, %p2552_p2 }
  0x29   :  { %2560 = shalt.err (!%p2557_p4)
}
  0x2a   :  { %s2561_s8 = scalar_lea.vmem %s46_s23, 512  ;;  %p2566_p6 = scmp.lt.s32.totalorder %s46_s23, %s46_s23 }
  0x2b   :  { %p2562_p5 = scmp.ne.s32.totalorder %s46_s23, %s2561_s8  ;;  %p2567_p7 = scmp.lt.s32.totalorder %s2561_s8, %s2561_s8 }
  0x2d   :  { %p2568_p8 = por %p2567_p7, %p2566_p6 }
  0x2f   :  { %p2569_p9 = pnand %p2568_p8, %p2562_p5 }
  0x31   :  { %2572 = shalt.err (!%p2569_p9)
}
  0x32   :  { %51 = dma.hbm_to_vmem [thread:$0]  %s2944_s3, 512, %s46_s23, [#allocation6], %s2603_s9, %s2603_s9, %s2604_s10  }
  0x33   :  { %2595 = dma.done.wait [#allocation3], 256  }
  0x34   :  { %2596 = vsyncadd [#allocation3], 4294967040 }
  0x35   :  { %2597 = dma.done.wait [#allocation6], 1024  }
  0x36   :  { %2598 = vsyncadd [#allocation6], 4294966272  ;;  %vm84_vm0 = vcmask 261120   ;;  %v68_v0 = vld [vmem:[#allocation5] sm:$0xff]  ;;  %v69_v1 = vld [vmem:[#allocation5 + $0x8] sm:$0xff]  ;;  %v2606_v8 = vmov 0.0  }
  0x37   :  { %v70_v2 = vld [vmem:[#allocation5 + $0x10] sm:$0xff]  ;;  %v2699_v3 = vpack.c.bf16 %v69_v1, %v68_v0  ;;  %v71_v4 = vld [vmem:[#allocation5 + $0x18] sm:$0xff]  ;;  %2243 = vmatprep.subr.mxu1 %v2606_v8  ;;  %vm2607_vm1 = vmmov 0   ;;  %s2608_s12 = smov 96   ;;  %vm320_vm2 = vcmask 64512   ;;  %s2609_s14 = smov 64  }
  0x38   :  { %v2701_v5 = vld [vmem:[#allocation2] sm:$0xff]  ;;  %v2703_v6 = vpack.c.bf16 %v71_v4, %v70_v2  ;;  %v2711_v7 = vld [vmem:[#allocation2 + $0x8] sm:$0xff]  ;;  %2245 = vmatprep.mubr.msk.f32.mxu1 %vm2607_vm1, %v2606_v8  ;;  %v73_v36 = vld [vmem:[#allocation7] sm:$0xff]  ;;  %vm2084_vm3 = vcmask 523264   ;;  %vm2087_vm4 = vcmask 785408  }
  0x39   :  { %2240 = vmatprep.mubr.msk.f32.mxu0 %vm84_vm0, %v2701_v5  ;;  %2401 = vmatprep.subr.bf16.mxu0 %v2699_v3  ;;  %v2721_v9 = vld [vmem:[%s2943_s2] ss:$0 sm:$0xff]  ;;  %v74_v37 = vld [vmem:[#allocation7 + $0x8] sm:$0xff]  ;;  %v76_v49 = vld [vmem:[#allocation7 + $0x18] sm:$0xff] }
  0x3a   :  { %2403 = vmatpush3.bf16.msra.mxu0 %v2699_v3  ;;  %v2740_v16 = vld [vmem:[%s2946_s5] sm:$0xff]  ;;  %v2755_v38 = vpack.c.bf16 %v74_v37, %v73_v36  ;;  %s2610_s5 = smov 32  }
  0x3b   :  { %2405 = vmatprep.subr.bf16.mxu0 %v2703_v6  ;;  %v75_v48 = vld [vmem:[#allocation7 + $0x10] sm:$0xff] }
  0x3c   :  { %v2772_v50 = vpack.c.bf16 %v76_v49, %v75_v48 }
  0x3e   :  { %2407 = vmatpush3.bf16.msra.mxu0 %v2703_v6 }
  0x3f   :  { %2409 = vmatprep.subr.bf16.mxu0 %v2755_v38 }
  0x41   :  { %2241 = vmatmul.mubr.msk.f32.vlgmr.msra.gmra.mrb[0].mxu0 %vm84_vm0, %v2711_v7 }
  0x42   :  { %2411 = vmatpush3.bf16.msra.mxu0 %v2755_v38 }
  0x43   :  { %2413 = vmatprep.subr.bf16.mxu0 %v2772_v50 }
  0x46   :  { %2415 = vmatpush3.bf16.msra.mxu0 %v2772_v50 }
  0x47   :  { %2285 = vmatprep.subr.mxu0 %v2606_v8 }
 0x114   :  { %v2242_v10 = vpop.f32.mrb[0].mxu0 }
 0x115   :  { %v157_v11 = vpop.f32.mrb[1].mxu0  ;;  %v163_v13 = vadd.f32 %v2242_v10, %v2721_v9 }
 0x116   :  { %v158_v12 = vadd.f32 %v2721_v9, %v157_v11 }
 0x118   :  { %167 = vrot.lane.b32.xlu0 %v158_v12, %s2608_s12 }
 0x11c   :  { %244 = vrot.lane.b32.xlu0 %v163_v13, %s2608_s12 }
 0x18a   :  { %v168_v14 = vpop.permute.xlu0 %167 }
 0x18b   :  { %2244 = vmatpush3.xpose.msk.msra.mxu1 %vm84_vm0, %v168_v14 }
 0x18c   :  { %2248 = vmatprep.subr.mxu1 %v2606_v8 }
 0x18e   :  { %2246 = vmatmul.mubr.msk.f32.vlgmr.msra.gmra.mrb[0].mxu1 %vm84_vm0, %v158_v12  ;;  %v245_v15 = vpop.permute.xlu0 %244 }
 0x18f   :  { %2249 = vmatpush3.xpose.msk.msra.mxu1 %vm84_vm0, %v245_v15  ;;  %2250 = vmatprep.mubr.msk.f32.mxu1 %vm2607_vm1, %v2606_v8 }
 0x190   :  { %2253 = vmatprep.subr.mxu1 %v2606_v8 }
 0x192   :  { %2251 = vmatmul.mubr.msk.f32.vlgmr.msra.gmra.mrb[2].mxu1 %vm84_vm0, %v163_v13 }
 0x193   :  { %2255 = vmatprep.mubr.msk.f32.mxu1 %vm2607_vm1, %v2606_v8 }
 0x261   :  { %v239_v17 = vpop.f32.mrb[0].mxu1 }
 0x262   :  { %v240_v18 = vadd.f32 %v239_v17, %v2740_v16  ;;  %v2247_v19 = vpop.f32.mrb[1].mxu1 }
 0x264   :  { %v321_v20 = vsel %vm320_vm2, %v240_v18, -inf }
 0x265   :  { %322 = vmax.xlane.f32.xlu1 %v321_v20  ;;  %v316_v21 = vpop.f32.mrb[2].mxu1 }
 0x266   :  { %v317_v22 = vadd.f32 %v316_v21, %v2740_v16  ;;  %v2252_v23 = vpop.f32.mrb[3].mxu1 }
 0x268   :  { %v324_v24 = vsel %vm320_vm2, %v317_v22, -inf }
 0x269   :  { %325 = vmax.xlane.f32.xlu1 %v324_v24 }
 0x27a   :  { %343 = vrot.lane.b32.xlu1 %v158_v12, %s2609_s14 }
 0x27e   :  { %419 = vrot.lane.b32.xlu1 %v163_v13, %s2609_s14 }
 0x282   :  { %582 = vrot.lane.b32.xlu1 %v2701_v5, %s2608_s12 }
 0x2f2   :  { %v323_v25 = vpop.xlane.xlu1 %322 }
 0x2f3   :  { %v327_v26 = vsub.f32 %v240_v18, %v323_v25 }
 0x2f5   :  { %v329_v27 = vmul.f32 1.442695, %v327_v26 }
 0x2f6   :  { %v326_v28 = vpop.xlane.xlu1 %325 }
 0x2f7   :  { %2475 = vpow2.f32 %v329_v27  ;;  %v328_v29 = vsub.f32 %v317_v22, %v326_v28 }
 0x2f9   :  { %v331_v30 = vmul.f32 1.442695, %v328_v29 }
 0x2fa   :  { %v344_v31 = vpop.permute.xlu1 %343 }
 0x2fb   :  { %2477 = vpow2.f32 %v331_v30  ;;  %2254 = vmatpush3.msra.mxu1 %v344_v31 }
 0x2fc   :  { %2258 = vmatprep.subr.mxu1 %v2606_v8 }
 0x2fe   :  { %v420_v39 = vpop.permute.xlu1 %419 }
 0x301   :  { %v2476_v32 = vpop.eup %2475 }
 0x302   :  { %v333_v33 = vsel %vm320_vm2, %v2476_v32, 0.0  ;;  %v583_v40 = vpop.permute.xlu1 %582 }
 0x303   :  { %334 = vadd.xlane.f32.xlu0 %v333_v33 }
 0x305   :  { %v2478_v34 = vpop.eup %2477 }
 0x306   :  { %v336_v35 = vsel %vm320_vm2, %v2478_v34, 0.0 }
 0x307   :  { %337 = vadd.xlane.f32.xlu1 %v336_v35 }
 0x318   :  { %584 = vrot.lane.b32.xlu1 %v2711_v7, %s2608_s12 }
 0x390   :  { %v335_v41 = vpop.xlane.xlu0 %334 }
 0x391   :  { %2479 = vrcp.f32 %v335_v41 }
 0x394   :  { %v338_v42 = vpop.xlane.xlu1 %337 }
 0x395   :  { %2481 = vrcp.f32 %v338_v42 }
 0x398   :  { %v585_v47 = vpop.permute.xlu1 %584 }
 0x39b   :  { %v2480_v43 = vpop.eup %2479 }
 0x39c   :  { %v341_v44 = vmul.f32 %v2480_v43, %v2476_v32 }
 0x39e   :  { %2256 = vmatmul.mubr.msk.f32.vlgmr.msra.gmra.mrb[4].mxu1 %vm320_vm2, %v341_v44 }
 0x39f   :  { %v2482_v45 = vpop.eup %2481  ;;  %2259 = vmatpush3.msra.mxu1 %v420_v39  ;;  %2260 = vmatprep.mubr.msk.f32.mxu1 %vm2607_vm1, %v2606_v8 }
 0x3a0   :  { %v342_v46 = vmul.f32 %v2482_v45, %v2478_v34  ;;  %2417 = vmatprep.subr.bf16.mxu1 %v2699_v3 }
 0x3a2   :  { %2261 = vmatmul.mubr.msk.f32.vlgmr.msra.gmra.mrb[6].mxu1 %vm320_vm2, %v342_v46 }
 0x3a3   :  { %2419 = vmatpush3.bf16.msra.mxu1 %v2699_v3  ;;  %2282 = vmatprep.mubr.msk.f32.mxu1 %vm84_vm0, %v583_v40 }
 0x3a4   :  { %2421 = vmatprep.subr.bf16.mxu1 %v2703_v6 }
 0x3a7   :  { %2423 = vmatpush3.bf16.msra.mxu1 %v2703_v6 }
 0x3a8   :  { %2290 = vmatprep.subr.mxu1 %v2606_v8 }
 0x3aa   :  { %2283 = vmatmul.mubr.msk.f32.vlgmr.msra.gmra.mrb[8].mxu1 %vm84_vm0, %v585_v47 }
 0x3ab   :  { %2292 = vmatprep.mubr.msk.f32.mxu1 %vm2607_vm1, %v2606_v8 }
 0x471   :  { %v415_v51 = vpop.f32.mrb[4].mxu1 }
 0x472   :  { %v2257_v52 = vpop.f32.mrb[5].mxu1  ;;  %2271 = vmatprep.mubr.msk.f32.mxu0 %vm84_vm0, %v415_v51 }
 0x475   :  { %v491_v53 = vpop.f32.mrb[6].mxu1 }
 0x476   :  { %v2262_v54 = vpop.f32.mrb[7].mxu1  ;;  %2272 = vmatmul.mubr.msk.f32.vlgmr.msra.gmra.mrb[2].mxu0 %vm84_vm0, %v491_v53 }
 0x477   :  { %2287 = vmatprep.mubr.msk.f32.mxu0 %vm2607_vm1, %v2606_v8 }
 0x47d   :  { %v2284_v55 = vpop.f32.mrb[8].mxu1 }
 0x47e   :  { %v662_v56 = vadd.f32 %v2284_v55, %v2721_v9  ;;  %v656_v57 = vpop.f32.mrb[9].mxu1 }
 0x47f   :  { %v657_v58 = vadd.f32 %v2721_v9, %v656_v57 }
 0x480   :  { %743 = vrot.lane.b32.xlu0 %v662_v56, %s2608_s12 }
 0x481   :  { %666 = vrot.lane.b32.xlu1 %v657_v58, %s2608_s12 }
 0x4f2   :  { %v744_v59 = vpop.permute.xlu0 %743 }
 0x4f3   :  { %2291 = vmatpush3.xpose.msk.msra.mxu1 %vm84_vm0, %v744_v59  ;;  %v667_v60 = vpop.permute.xlu1 %666 }
 0x4f4   :  { %2286 = vmatpush3.xpose.msk.msra.mxu0 %vm84_vm0, %v667_v60  ;;  %2300 = vmatprep.subr.mxu1 %v2606_v8 }
 0x4f5   :  { %2295 = vmatprep.subr.mxu0 %v2606_v8 }
 0x4f6   :  { %2293 = vmatmul.mubr.msk.f32.vlgmr.msra.gmra.mrb[10].mxu1 %vm84_vm0, %v662_v56 }
 0x4f7   :  { %2288 = vmatmul.mubr.msk.f32.vlgmr.msra.gmra.mrb[4].mxu0 %vm84_vm0, %v657_v58  ;;  %2302 = vmatprep.mubr.msk.f32.mxu1 %vm2607_vm1, %v2606_v8 }
 0x4f8   :  { %2297 = vmatprep.mubr.msk.f32.mxu0 %vm2607_vm1, %v2606_v8 }
 0x549   :  { %v2795_v61 = vpop.f32.mrb[2].mxu0 }
 0x54a   :  { %v2797_v62 = vpop.f32.mrb[3].mxu0 }
 0x5c9   :  { %v815_v63 = vpop.f32.mrb[10].mxu1 }
 0x5ca   :  { %v816_v0 = vadd.f32 %v815_v63, %v2740_v16  ;;  %v738_v1 = vpop.f32.mrb[4].mxu0  ;;  %v2294_v2 = vpop.f32.mrb[11].mxu1 }
 0x5cb   :  { %v2289_v4 = vpop.f32.mrb[5].mxu0  ;;  %v739_v11 = vadd.f32 %v738_v1, %v2740_v16 }
 0x5cc   :  { %v822_v10 = vsel %vm320_vm2, %v816_v0, -inf }
 0x5cd   :  { %823 = vmax.xlane.f32.xlu1 %v822_v10  ;;  %v819_v12 = vsel %vm320_vm2, %v739_v11, -inf }
 0x5de   :  { %917 = vrot.lane.b32.xlu1 %v662_v56, %s2609_s14 }
 0x5e2   :  { %1076 = vrot.lane.b32.xlu1 %v2711_v7, %s2609_s14 }
 0x606   :  { %820 = vmax.xlane.f32.xlu1 %v819_v12 }
 0x617   :  { %841 = vrot.lane.b32.xlu1 %v657_v58, %s2609_s14 }
 0x65a   :  { %v824_v13 = vpop.xlane.xlu1 %823 }
 0x65b   :  { %v826_v14 = vsub.f32 %v816_v0, %v824_v13 }
 0x65d   :  { %v829_v15 = vmul.f32 1.442695, %v826_v14 }
 0x65e   :  { %v918_v17 = vpop.permute.xlu1 %917 }
 0x65f   :  { %2483 = vpow2.f32 %v829_v15  ;;  %2301 = vmatpush3.msra.mxu1 %v918_v17 }
 0x660   :  { %2433 = vmatprep.subr.bf16.mxu1 %v2699_v3 }
 0x662   :  { %v1077_v20 = vpop.permute.xlu1 %1076 }
 0x669   :  { %v2484_v18 = vpop.eup %2483 }
 0x66a   :  { %v834_v19 = vsel %vm320_vm2, %v2484_v18, 0.0 }
 0x66b   :  { %835 = vadd.xlane.f32.xlu0 %v834_v19 }
 0x681   :  { %1074 = vrot.lane.b32.xlu0 %v2701_v5, %s2609_s14 }
 0x693   :  { %v821_v21 = vpop.xlane.xlu1 %820 }
 0x694   :  { %v825_v22 = vsub.f32 %v739_v11, %v821_v21 }
 0x696   :  { %v827_v23 = vmul.f32 1.442695, %v825_v22 }
 0x697   :  { %v842_v24 = vpop.permute.xlu1 %841 }
 0x698   :  { %2485 = vpow2.f32 %v827_v23  ;;  %2296 = vmatpush3.msra.mxu0 %v842_v24 }
 0x699   :  { %2425 = vmatprep.subr.bf16.mxu0 %v2755_v38 }
 0x6a2   :  { %v2486_v25 = vpop.eup %2485 }
 0x6a3   :  { %v831_v26 = vsel %vm320_vm2, %v2486_v25, 0.0 }
 0x6a4   :  { %832 = vadd.xlane.f32.xlu0 %v831_v26 }
 0x6f8   :  { %v836_v27 = vpop.xlane.xlu0 %835 }
 0x6f9   :  { %2487 = vrcp.f32 %v836_v27 }
 0x6fc   :  { %v1075_v30 = vpop.permute.xlu0 %1074 }
 0x703   :  { %v2488_v28 = vpop.eup %2487 }
 0x704   :  { %v840_v29 = vmul.f32 %v2488_v28, %v2484_v18 }
 0x706   :  { %2303 = vmatmul.mubr.msk.f32.vlgmr.msra.gmra.mrb[12].mxu1 %vm320_vm2, %v840_v29 }
 0x707   :  { %2435 = vmatpush3.bf16.msra.mxu1 %v2699_v3  ;;  %2324 = vmatprep.mubr.msk.f32.mxu1 %vm84_vm0, %v1075_v30 }
 0x708   :  { %2437 = vmatprep.subr.bf16.mxu1 %v2703_v6 }
 0x70b   :  { %2439 = vmatpush3.bf16.msra.mxu1 %v2703_v6 }
 0x70c   :  { %2332 = vmatprep.subr.mxu1 %v2606_v8 }
 0x70e   :  { %2325 = vmatmul.mubr.msk.f32.vlgmr.msra.gmra.mrb[14].mxu1 %vm84_vm0, %v1077_v20 }
 0x70f   :  { %2334 = vmatprep.mubr.msk.f32.mxu1 %vm2607_vm1, %v2606_v8 }
 0x731   :  { %v833_v31 = vpop.xlane.xlu0 %832 }
 0x732   :  { %2489 = vrcp.f32 %v833_v31 }
 0x73c   :  { %v2490_v32 = vpop.eup %2489 }
 0x73d   :  { %v839_v33 = vmul.f32 %v2490_v32, %v2486_v25 }
 0x73f   :  { %2298 = vmatmul.mubr.msk.f32.vlgmr.msra.gmra.mrb[6].mxu0 %vm320_vm2, %v839_v33 }
 0x740   :  { %2427 = vmatpush3.bf16.msra.mxu0 %v2755_v38 }
 0x741   :  { %2429 = vmatprep.subr.bf16.mxu0 %v2772_v50 }
 0x744   :  { %2431 = vmatpush3.bf16.msra.mxu0 %v2772_v50 }
 0x745   :  { %2327 = vmatprep.subr.mxu0 %v2606_v8 }
 0x7d9   :  { %v989_v34 = vpop.f32.mrb[12].mxu1 }
 0x7da   :  { %v2304_v35 = vpop.f32.mrb[13].mxu1 }
 0x7e1   :  { %v2326_v36 = vpop.f32.mrb[14].mxu1 }
 0x7e2   :  { %v1154_v37 = vadd.f32 %v2326_v36, %v2721_v9  ;;  %v1148_v39 = vpop.f32.mrb[15].mxu1 }
 0x7e3   :  { %v1149_v40 = vadd.f32 %v2721_v9, %v1148_v39 }
 0x7e4   :  { %1235 = vrot.lane.b32.xlu0 %v1154_v37, %s2608_s12 }
 0x7e5   :  { %1158 = vrot.lane.b32.xlu1 %v1149_v40, %s2608_s12 }
 0x812   :  { %v913_v41 = vpop.f32.mrb[6].mxu0 }
 0x813   :  { %v2299_v42 = vpop.f32.mrb[7].mxu0  ;;  %2313 = vmatprep.mubr.msk.f32.mxu0 %vm84_vm0, %v913_v41 }
 0x814   :  { %2314 = vmatmul.mubr.msk.f32.vlgmr.msra.gmra.mrb[8].mxu0 %vm84_vm0, %v989_v34 }
 0x815   :  { %2329 = vmatprep.mubr.msk.f32.mxu0 %vm2607_vm1, %v2606_v8 }
 0x856   :  { %v1236_v43 = vpop.permute.xlu0 %1235 }
 0x857   :  { %2333 = vmatpush3.xpose.msk.msra.mxu1 %vm84_vm0, %v1236_v43  ;;  %v1159_v44 = vpop.permute.xlu1 %1158 }
 0x858   :  { %2328 = vmatpush3.xpose.msk.msra.mxu0 %vm84_vm0, %v1159_v44  ;;  %2342 = vmatprep.subr.mxu1 %v2606_v8 }
 0x859   :  { %2337 = vmatprep.subr.mxu0 %v2606_v8 }
 0x85a   :  { %2335 = vmatmul.mubr.msk.f32.vlgmr.msra.gmra.mrb[16].mxu1 %vm84_vm0, %v1154_v37 }
 0x85b   :  { %2330 = vmatmul.mubr.msk.f32.vlgmr.msra.gmra.mrb[10].mxu0 %vm84_vm0, %v1149_v40  ;;  %2344 = vmatprep.mubr.msk.f32.mxu1 %vm2607_vm1, %v2606_v8 }
 0x85c   :  { %2339 = vmatprep.mubr.msk.f32.mxu0 %vm2607_vm1, %v2606_v8 }
 0x8e7   :  { %v2845_v45 = vpop.f32.mrb[8].mxu0 }
 0x8e8   :  { %v2847_v46 = vpop.f32.mrb[9].mxu0 }
 0x92d   :  { %v1307_v47 = vpop.f32.mrb[16].mxu1 }
 0x92e   :  { %v1308_v48 = vadd.f32 %v1307_v47, %v2740_v16  ;;  %v1230_v49 = vpop.f32.mrb[10].mxu0  ;;  %v2336_v51 = vpop.f32.mrb[17].mxu1 }
 0x92f   :  { %v1231_v52 = vadd.f32 %v1230_v49, %v2740_v16  ;;  %v2331_v53 = vpop.f32.mrb[11].mxu0 }
 0x930   :  { %v1314_v54 = vsel %vm320_vm2, %v1308_v48, -inf }
 0x931   :  { %1315 = vmax.xlane.f32.xlu1 %v1314_v54  ;;  %v1311_v55 = vsel %vm320_vm2, %v1231_v52, -inf }
 0x932   :  { %1312 = vmax.xlane.f32.xlu0 %v1311_v55 }
 0x942   :  { %1566 = vrot.lane.b32.xlu1 %v2701_v5, %s2610_s5 }
 0x948   :  { %1409 = vrot.lane.b32.xlu0 %v1154_v37, %s2609_s14 }
 0x9be   :  { %v1316_v56 = vpop.xlane.xlu1 %1315 }
 0x9bf   :  { %v1318_v57 = vsub.f32 %v1308_v48, %v1316_v56  ;;  %v1313_v58 = vpop.xlane.xlu0 %1312 }
 0x9c0   :  { %v1317_v59 = vsub.f32 %v1231_v52, %v1313_v58 }
 0x9c1   :  { %v1321_v60 = vmul.f32 1.442695, %v1318_v57 }
 0x9c2   :  { %v1319_v63 = vmul.f32 1.442695, %v1317_v59  ;;  %v1567_v10 = vpop.permute.xlu1 %1566 }
 0x9c3   :  { %2491 = vpow2.f32 %v1321_v60  ;;  %v1410_v0 = vpop.permute.xlu0 %1409 }
 0x9c4   :  { %2493 = vpow2.f32 %v1319_v63  ;;  %2343 = vmatpush3.msra.mxu1 %v1410_v0 }
 0x9c5   :  { %2449 = vmatprep.subr.bf16.mxu1 %v2699_v3 }
 0x9cd   :  { %v2492_v1 = vpop.eup %2491 }
 0x9ce   :  { %v2494_v2 = vpop.eup %2493  ;;  %v1326_v4 = vsel %vm320_vm2, %v2492_v1, 0.0 }
 0x9cf   :  { %1327 = vadd.xlane.f32.xlu1 %v1326_v4  ;;  %v1323_v5 = vsel %vm320_vm2, %v2494_v2, 0.0 }
 0x9d0   :  { %1324 = vadd.xlane.f32.xlu0 %v1323_v5 }
 0x9e0   :  { %1568 = vrot.lane.b32.xlu1 %v2711_v7, %s2610_s5 }
 0x9e4   :  { %1333 = vrot.lane.b32.xlu1 %v1149_v40, %s2609_s14 }
 0xa5c   :  { %v1328_v11 = vpop.xlane.xlu1 %1327 }
 0xa5d   :  { %2495 = vrcp.f32 %v1328_v11  ;;  %v1325_v12 = vpop.xlane.xlu0 %1324 }
 0xa5e   :  { %2497 = vrcp.f32 %v1325_v12 }
 0xa60   :  { %v1569_v13 = vpop.permute.xlu1 %1568 }
 0xa64   :  { %v1334_v14 = vpop.permute.xlu1 %1333 }
 0xa65   :  { %2338 = vmatpush3.msra.mxu0 %v1334_v14 }
 0xa66   :  { %2441 = vmatprep.subr.bf16.mxu0 %v2755_v38 }
 0xa67   :  { %v2496_v15 = vpop.eup %2495 }
 0xa68   :  { %v2498_v17 = vpop.eup %2497  ;;  %v1332_v18 = vmul.f32 %v2496_v15, %v2492_v1 }
 0xa69   :  { %v1331_v19 = vmul.f32 %v2498_v17, %v2494_v2 }
 0xa6a   :  { %2345 = vmatmul.mubr.msk.f32.vlgmr.msra.gmra.mrb[18].mxu1 %vm320_vm2, %v1332_v18 }
 0xa6b   :  { %2451 = vmatpush3.bf16.msra.mxu1 %v2699_v3  ;;  %2340 = vmatmul.mubr.msk.f32.vlgmr.msra.gmra.mrb[12].mxu0 %vm320_vm2, %v1331_v19 }
 0xa6c   :  { %2366 = vmatprep.mubr.msk.f32.mxu1 %vm84_vm0, %v1567_v10  ;;  %2453 = vmatprep.subr.bf16.mxu1 %v2703_v6 }
 0xa6d   :  { %2443 = vmatpush3.bf16.msra.mxu0 %v2755_v38 }
 0xa6e   :  { %2445 = vmatprep.subr.bf16.mxu0 %v2772_v50 }
 0xa6f   :  { %2455 = vmatpush3.bf16.msra.mxu1 %v2703_v6 }
 0xa70   :  { %2374 = vmatprep.subr.mxu1 %v2606_v8 }
 0xa71   :  { %2447 = vmatpush3.bf16.msra.mxu0 %v2772_v50 }
 0xa72   :  { %2367 = vmatmul.mubr.msk.f32.vlgmr.msra.gmra.mrb[20].mxu1 %vm84_vm0, %v1569_v13  ;;  %2369 = vmatprep.subr.mxu0 %v2606_v8 }
 0xa73   :  { %2376 = vmatprep.mubr.msk.f32.mxu1 %vm2607_vm1, %v2606_v8 }
 0xb3d   :  { %v1481_v3 = vpop.f32.mrb[18].mxu1 }
 0xb3e   :  { %v1405_v7 = vpop.f32.mrb[12].mxu0  ;;  %v2346_v20 = vpop.f32.mrb[19].mxu1 }
 0xb3f   :  { %v2341_v21 = vpop.f32.mrb[13].mxu0  ;;  %2355 = vmatprep.mubr.msk.f32.mxu0 %vm84_vm0, %v1405_v7 }
 0xb40   :  { %2356 = vmatmul.mubr.msk.f32.vlgmr.msra.gmra.mrb[14].mxu0 %vm84_vm0, %v1481_v3 }
 0xb41   :  { %2371 = vmatprep.mubr.msk.f32.mxu0 %vm2607_vm1, %v2606_v8 }
 0xb45   :  { %v2368_v6 = vpop.f32.mrb[20].mxu1 }
 0xb46   :  { %v1640_v22 = vpop.f32.mrb[21].mxu1  ;;  %v1646_v24 = vadd.f32 %v2368_v6, %v2721_v9 }
 0xb47   :  { %v1641_v23 = vadd.f32 %v2721_v9, %v1640_v22 }
 0xb49   :  { %1650 = vrot.lane.b32.xlu1 %v1641_v23, %s2608_s12 }
 0xb4d   :  { %1727 = vrot.lane.b32.xlu1 %v1646_v24, %s2608_s12 }
 0xbbb   :  { %v1651_v25 = vpop.permute.xlu1 %1650 }
 0xbbc   :  { %2370 = vmatpush3.xpose.msk.msra.mxu0 %vm84_vm0, %v1651_v25 }
 0xbbd   :  { %2379 = vmatprep.subr.mxu0 %v2606_v8 }
 0xbbf   :  { %2372 = vmatmul.mubr.msk.f32.vlgmr.msra.gmra.mrb[16].mxu0 %vm84_vm0, %v1641_v23  ;;  %v1728_v26 = vpop.permute.xlu1 %1727 }
 0xbc0   :  { %2375 = vmatpush3.xpose.msk.msra.mxu1 %vm84_vm0, %v1728_v26  ;;  %2381 = vmatprep.mubr.msk.f32.mxu0 %vm2607_vm1, %v2606_v8 }
 0xbc1   :  { %2384 = vmatprep.subr.mxu1 %v2606_v8 }
 0xbc3   :  { %2377 = vmatmul.mubr.msk.f32.vlgmr.msra.gmra.mrb[22].mxu1 %vm84_vm0, %v1646_v24 }
 0xbc4   :  { %2386 = vmatprep.mubr.msk.f32.mxu1 %vm2607_vm1, %v2606_v8  ;;  %v2119_v8 = vld [vmem:[%s2945_s4] ss:$0 sm:$0xff]  ;;  %s2611_s4 = smov [#allocation8]  }
 0xbc5   :  { %v1071_v36 = vadd.f32 %v2845_v45, %v2119_v8  ;;  %v1066_v51 = vadd.f32 %v2119_v8, %v2847_v46  ;;  %v574_v13 = vadd.f32 %v2119_v8, %v2797_v62  ;;  %s2097_s17 = sshll.u32 %s2611_s4, 4  ;;  %s2098_s17 = int_to_ptr.vmem [resolvable:$true] %s2097_s17 }
 0xbc6   :  { %s2573_s18 = scalar_lea.vmem %s2098_s17, 256  ;;  %p2578_p11 = scmp.lt.s32.totalorder %s2098_s17, %s2098_s17 }
 0xbc7   :  { %p2574_p10 = scmp.ne.s32.totalorder %s2098_s17, %s2573_s18  ;;  %p2579_p12 = scmp.lt.s32.totalorder %s2573_s18, %s2573_s18 }
 0xbc9   :  { %p2580_p13 = por %p2579_p12, %p2578_p11 }
 0xbcb   :  { %p2581_p0 = pnand %p2580_p13, %p2574_p10 }
 0xc13   :  { %v2357_v9 = vpop.f32.mrb[14].mxu0 }
 0xc14   :  { %v1557_v27 = vpop.f32.mrb[15].mxu0  ;;  %v1563_v37 = vadd.f32 %v2357_v9, %v2119_v8 }
 0xc15   :  { %v1558_v52 = vadd.f32 %v2119_v8, %v1557_v27 }
 0xc92   :  { %v1722_v28 = vpop.f32.mrb[16].mxu0 }
 0xc93   :  { %v1723_v29 = vadd.f32 %v1722_v28, %v2740_v16  ;;  %v2373_v30 = vpop.f32.mrb[17].mxu0 }
 0xc95   :  { %v1803_v31 = vsel %vm320_vm2, %v1723_v29, -inf }
 0xc96   :  { %1804 = vmax.xlane.f32.xlu1 %v1803_v31  ;;  %v1799_v32 = vpop.f32.mrb[22].mxu1 }
 0xc97   :  { %v1800_v33 = vadd.f32 %v1799_v32, %v2740_v16  ;;  %v2378_v34 = vpop.f32.mrb[23].mxu1 }
 0xc99   :  { %v1806_v35 = vsel %vm320_vm2, %v1800_v33, -inf }
 0xc9a   :  { %1807 = vmax.xlane.f32.xlu0 %v1806_v35 }
 0xca7   :  { %1901 = vrot.lane.b32.xlu1 %v1646_v24, %s2609_s14 }
 0xcab   :  { %2062 = vrot.lane.b32.xlu1 %v1071_v36, %s2610_s5 }
 0xcaf   :  { %2070 = vrot.lane.b32.xlu1 %v1563_v37, %s2609_s14 }
 0xd23   :  { %v1805_v39 = vpop.xlane.xlu1 %1804 }
 0xd24   :  { %v1809_v40 = vsub.f32 %v1723_v29, %v1805_v39 }
 0xd26   :  { %v1811_v43 = vmul.f32 1.442695, %v1809_v40 }
 0xd27   :  { %v1808_v16 = vpop.xlane.xlu0 %1807  ;;  %v1902_v41 = vpop.permute.xlu1 %1901 }
 0xd28   :  { %v1810_v42 = vsub.f32 %v1800_v33, %v1808_v16  ;;  %2385 = vmatpush3.msra.mxu1 %v1902_v41 }
 0xd2a   :  { %v1813_v44 = vmul.f32 1.442695, %v1810_v42 }
 0xd2c   :  { %2499 = vpow2.f32 %v1813_v44 }
 0xd2d   :  { %2501 = vpow2.f32 %v1811_v43 }
 0xd36   :  { %v2500_v47 = vpop.eup %2499 }
 0xd37   :  { %v1818_v48 = vsel %vm320_vm2, %v2500_v47, 0.0  ;;  %v2502_v49 = vpop.eup %2501 }
 0xd38   :  { %1819 = vadd.xlane.f32.xlu0 %v1818_v48  ;;  %v1815_v45 = vsel %vm320_vm2, %v2502_v49, 0.0 }
 0xd3c   :  { %1816 = vadd.xlane.f32.xlu0 %v1815_v45 }
 0xd52   :  { %1825 = vrot.lane.b32.xlu0 %v1641_v23, %s2609_s14 }
 0xd56   :  { %2060 = vrot.lane.b32.xlu0 %v1066_v51, %s2610_s5 }
 0xd5a   :  { %2068 = vrot.lane.b32.xlu0 %v1558_v52, %s2609_s14 }
 0xdc5   :  { %v1820_v53 = vpop.xlane.xlu0 %1819 }
 0xdc6   :  { %2503 = vrcp.f32 %v1820_v53 }
 0xdc9   :  { %v1817_v54 = vpop.xlane.xlu0 %1816 }
 0xdca   :  { %2505 = vrcp.f32 %v1817_v54 }
 0xdcd   :  { %v1826_v55 = vpop.permute.xlu0 %1825 }
 0xdce   :  { %2380 = vmatpush3.msra.mxu0 %v1826_v55 }
 0xdcf   :  { %2457 = vmatprep.subr.bf16.mxu0 %v2755_v38 }
 0xdd0   :  { %v2504_v56 = vpop.eup %2503 }
 0xdd1   :  { %v1824_v57 = vmul.f32 %v2504_v56, %v2500_v47  ;;  %v2061_v10 = vpop.permute.xlu0 %2060 }
 0xdd2   :  { %v2082_v17 = vsel %vm84_vm0, %v574_v13, %v2061_v10 }
 0xdd3   :  { %2387 = vmatmul.mubr.msk.f32.vlgmr.msra.gmra.mrb[24].mxu1 %vm320_vm2, %v1824_v57 }
 0xdd4   :  { %v2506_v58 = vpop.eup %2505 }
 0xdd5   :  { %v1823_v59 = vmul.f32 %v2506_v58, %v2502_v49  ;;  %v2069_v12 = vpop.permute.xlu0 %2068 }
 0xdd6   :  { %v2085_v19 = vsel %vm2084_vm3, %v2082_v17, %v2069_v12 }
 0xdd7   :  { %2382 = vmatmul.mubr.msk.f32.vlgmr.msra.gmra.mrb[18].mxu0 %vm320_vm2, %v1823_v59 }
 0xdd8   :  { %2459 = vmatpush3.bf16.msra.mxu0 %v2755_v38  ;;  %v2063_v38 = vpop.permute.xlu1 %2062 }
 0xdd9   :  { %2461 = vmatprep.subr.bf16.mxu0 %v2772_v50 }
 0xddc   :  { %2463 = vmatpush3.bf16.msra.mxu0 %v2772_v50  ;;  %v2071_v11 = vpop.permute.xlu1 %2070  ;;  %v579_v50 = vadd.f32 %v2795_v61, %v2119_v8 }
 0xdde   :  { %v2083_v14 = vsel %vm84_vm0, %v579_v50, %v2063_v38 }
 0xddf   :  { %v2086_v15 = vsel %vm2084_vm3, %v2083_v14, %v2071_v11 }
 0xea6   :  { %v1973_v46 = vpop.f32.mrb[24].mxu1 }
 0xea7   :  { %v2388_v60 = vpop.f32.mrb[25].mxu1 }
 0xeaa   :  { %v1897_v63 = vpop.f32.mrb[18].mxu0 }
 0xeab   :  { %v2383_v0 = vpop.f32.mrb[19].mxu0  ;;  %2397 = vmatprep.mubr.msk.f32.mxu0 %vm84_vm0, %v1897_v63 }
 0xeac   :  { %2398 = vmatmul.mubr.msk.f32.vlgmr.msra.gmra.mrb[20].mxu0 %vm84_vm0, %v1973_v46 }
 0xf7f   :  { %v2399_v1 = vpop.f32.mrb[20].mxu0 }
 0xf80   :  { %v2055_v2 = vadd.f32 %v2399_v1, %v2119_v8  ;;  %v2049_v4 = vpop.f32.mrb[21].mxu0 }
 0xf81   :  { %v2050_v5 = vadd.f32 %v2119_v8, %v2049_v4 }
 0xf82   :  { %2078 = vrot.lane.b32.xlu1 %v2055_v2, %s2608_s12 }
 0xf83   :  { %2076 = vrot.lane.b32.xlu0 %v2050_v5, %s2608_s12 }
 0xff4   :  { %v2079_v18 = vpop.permute.xlu1 %2078 }
 0xff5   :  { %v2089_v3 = vsel %vm2087_vm4, %v2086_v15, %v2079_v18  ;;  %v2077_v7 = vpop.permute.xlu0 %2076 }
 0xff6   :  { %2091 = vst [vmem:[#allocation8 + $0x8] sm:$0xff] %v2089_v3  ;;  %v2088_v20 = vsel %vm2087_vm4, %v2085_v19, %v2077_v7 }
 0xff7   :  { %2090 = vst [vmem:[#allocation8] sm:$0xff] %v2088_v20 }
 0xff8   :  { %2584 = shalt.err (!%p2581_p0)
}
 0xff9   :  { %s2585_s1 = scalar_lea.hbm %s2947_s6, 256 }
 0xffa   :  { %p2586_p1 = scmp.ne.s32.totalorder %s2947_s6, %s2585_s1  ;;  %p2589_p2 = scmp.lt.u32.totalorder %s2585_s1, %s2947_s6 }
 0xffc   :  { %p2591_p3 = pnand %p2589_p2, %p2586_p1 }
 0xffe   :  { %2594 = shalt.err (!%p2591_p3)
}
 0xfff   :  { %2103 = dma.vmem_to_hbm [thread:$0]  %s2098_s17, 256, %s2947_s6, [#allocation4], %s2603_s9, %s2603_s9, %s2604_s10  }
0x1000   :  { %2599 = dma.done.wait [#allocation4], 256  }
0x1001   :  { %2600 = vsyncadd [#allocation4], 4294967040 }
0x1002   :  { %2107 = vsyncpa [#allocation3], 1 }
0x1003   :  { %2108 = vsyncpa [#allocation6], 1 }
0x1004   :  { %2109 = vsyncpa [#allocation4], 1 }

</bundles_post_ra>
